<compile_context>
chip_gen: v7x
topology: tpu7x:2x2x1
jax: 0.10.0
libtpu: 0.0.40
codegen_flags: <defaults>
</compile_context>

<pallas_src>
import math
from functools import partial

import jax
import jax.numpy as jnp
from jax import lax
from jax.experimental import pallas as pl
from jax.experimental.pallas import tpu as pltpu


def attention_head_kernel(x_ref, wqkv_ref, bqkv_ref, o_ref, *,
                          head_dim, compute_dtype):
    """One grid step = one batch item; full single-head attention in-step."""
    x = x_ref[...].astype(compute_dtype)        # (S, E)
    w = wqkv_ref[...].astype(compute_dtype)     # (E, 3*Dh)  [Wq | Wk | Wv]
    b = bqkv_ref[...]                           # (1, 3*Dh)  f32

    # Fused QKV projection, f32 accumulation on the MXU, fused bias add.
    qkv = jnp.dot(x, w, preferred_element_type=jnp.float32) + b   # (S, 3*Dh)
    q = qkv[:, 0 * head_dim:1 * head_dim]
    k = qkv[:, 1 * head_dim:2 * head_dim]
    v = qkv[:, 2 * head_dim:3 * head_dim]

    # scores = q @ k^T / sqrt(Dh), contracting last dims directly (no .T).
    scale = 1.0 / math.sqrt(head_dim)
    scores = lax.dot_general(q, k, (((1,), (1,)), ((), ())),
                             preferred_element_type=jnp.float32) * scale  # (S,S)

    # TODO(synk): for realistic S (>= ~2k) tile the query axis and use a
    # flash-style online softmax over KV tiles so the (S, S) score tile fits
    # VMEM (mandatory on v7x's 64 MiB VMEM); at S=8 the monolithic tile is fine.

    # Row softmax, all in f32. No mask in this module's forward.
    scores = scores - jnp.max(scores, axis=-1, keepdims=True)
    p = jnp.exp(scores)
    weights = p * pl.reciprocal(jnp.sum(p, axis=-1, keepdims=True), approx=True)

    out = jnp.dot(weights.astype(compute_dtype), v.astype(compute_dtype),
                  preferred_element_type=jnp.float32)              # (S, Dh)
    o_ref[...] = out.astype(o_ref.dtype)


def attention_head(x, wq, bq, wk, bk, wv, bv, *, compute_dtype=jnp.float32):
    """x: (B, S, E); wq/wk/wv: (E, Dh); bq/bk/bv: (1, Dh) -> (B, S, Dh)."""
    B, S, E = x.shape
    Dh = wq.shape[1]

    # Stack the three projections so one DMA + one matmul covers Q, K and V.
    wqkv = jnp.concatenate([wq, wk, wv], axis=1)    # (E, 3*Dh)
    bqkv = jnp.concatenate([bq, bk, bv], axis=1)    # (1, 3*Dh)

    kernel = partial(attention_head_kernel, head_dim=Dh,
                     compute_dtype=compute_dtype)

    return pl.pallas_call(
        kernel,
        out_shape=jax.ShapeDtypeStruct((B, S, Dh), jnp.float32),
        grid_spec=pltpu.PrefetchScalarGridSpec(
            num_scalar_prefetch=0,
            grid=(B,),
            in_specs=[
                pl.BlockSpec((None, S, E), lambda b: (b, 0, 0)),   # x -> (S, E)
                pl.BlockSpec((E, 3 * Dh), lambda b: (0, 0)),       # fused Wqkv
                pl.BlockSpec((1, 3 * Dh), lambda b: (0, 0)),       # fused bqkv
            ],
            out_specs=pl.BlockSpec((None, S, Dh), lambda b: (b, 0, 0)),
        ),
        compiler_params=pltpu.CompilerParams(
            dimension_semantics=("parallel",)),   # batch items shard across TCs
    )(x, wqkv, bqkv)


def reference_attention_head(x, wq, bq, wk, bk, wv, bv):
    """Pure-JAX reference matching the PyTorch AttentionHead forward."""
    Dh = wq.shape[1]
    q = x @ wq + bq
    k = x @ wk + bk
    v = x @ wv + bv
    scores = jnp.einsum("bsd,btd->bst", q, k) / math.sqrt(Dh)
    w = jax.nn.softmax(scores, axis=-1)
    return jnp.einsum("bst,btd->bsd", w, v)


if __name__ == "__main__":
    # Config consistent with the module: embed_dim=32, head_dim=8.
    B, S, E, Dh = 2, 8, 32, 8

    key = jax.random.PRNGKey(0)
    ks = jax.random.split(key, 7)
    scale = 0.1
    x = jax.random.normal(ks[0], (B, S, E), dtype=jnp.float32)
    wq = scale * jax.random.normal(ks[1], (E, Dh), dtype=jnp.float32)
    bq = scale * jax.random.normal(ks[2], (1, Dh), dtype=jnp.float32)
    wk = scale * jax.random.normal(ks[3], (E, Dh), dtype=jnp.float32)
    bk = scale * jax.random.normal(ks[4], (1, Dh), dtype=jnp.float32)
    wv = scale * jax.random.normal(ks[5], (E, Dh), dtype=jnp.float32)
    bv = scale * jax.random.normal(ks[6], (1, Dh), dtype=jnp.float32)

    ref = reference_attention_head(x, wq, bq, wk, bk, wv, bv)

    # f32 MXU path (only the approx EUP reciprocal differs from the reference).
    out = attention_head(x, wq, bq, wk, bk, wv, bv, compute_dtype=jnp.float32)
    out = jax.block_until_ready(out)
    assert out.shape == (B, S, Dh)
    assert jnp.allclose(out, ref, atol=5e-3, rtol=5e-3), "f32 path mismatch"

    print("KERNEL_OK")
</pallas_src>

<mosaic_0001>
module attributes {stable_mosaic.version = 11 : i64} {
  func.func @attention_head_kernel(%arg0: i32, %arg1: memref<1x8x32xf32, #tpu.memory_space<vmem>>, %arg2: memref<32x24xf32, #tpu.memory_space<vmem>>, %arg3: memref<1x24xf32, #tpu.memory_space<vmem>>, %arg4: memref<1x8x8xf32, #tpu.memory_space<vmem>>) attributes {dimension_semantics = [#tpu.dimension_semantics<parallel>], iteration_bounds = array<i64: 2>, scalar_prefetch = 0 : i64, scratch_operands = 0 : i64, tpu.core_type = #tpu.core_type<tc>, window_params = [{transform_indices = @transform_0, window_bounds = array<i64: 1, 8, 32>}, {pipeline_mode = #tpu.pipeline_mode<synchronous>, transform_indices = @transform_1, window_bounds = array<i64: 32, 24>}, {pipeline_mode = #tpu.pipeline_mode<synchronous>, transform_indices = @transform_2, window_bounds = array<i64: 1, 24>}, {transform_indices = @transform_3, window_bounds = array<i64: 1, 8, 8>}]} {
    %c0 = arith.constant 0 : index
    %c0_0 = arith.constant 0 : index
    %c0_1 = arith.constant 0 : index
    %0 = vector.load %arg1[%c0, %c0_0, %c0_1] : memref<1x8x32xf32, #tpu.memory_space<vmem>>, vector<1x8x32xf32>
    %1 = vector.shape_cast %0 : vector<1x8x32xf32> to vector<8x32xf32>
    %c0_2 = arith.constant 0 : index
    %c0_3 = arith.constant 0 : index
    %2 = vector.load %arg2[%c0_2, %c0_3] : memref<32x24xf32, #tpu.memory_space<vmem>>, vector<32x24xf32>
    %c0_4 = arith.constant 0 : index
    %c0_5 = arith.constant 0 : index
    %3 = vector.load %arg3[%c0_4, %c0_5] : memref<1x24xf32, #tpu.memory_space<vmem>>, vector<1x24xf32>
    %cst = arith.constant dense<0.000000e+00> : vector<8x24xf32>
    %4 = tpu.matmul %1, %2, %cst {dimension_numbers = #tpu.dot_dimension_numbers<[1], [0], [0], [1], [0, 0, 1, 1], [], []>} : vector<8x32xf32>, vector<32x24xf32>, vector<8x24xf32> -> vector<8x24xf32>
    %5 = vector.broadcast %3 : vector<1x24xf32> to vector<8x24xf32>
    %6 = arith.addf %4, %5 : vector<8x24xf32>
    %7 = vector.extract_strided_slice %6 {offsets = [0, 0], sizes = [8, 8], strides = [1, 1]} : vector<8x24xf32> to vector<8x8xf32>
    %8 = vector.extract_strided_slice %6 {offsets = [0, 8], sizes = [8, 8], strides = [1, 1]} : vector<8x24xf32> to vector<8x8xf32>
    %9 = vector.extract_strided_slice %6 {offsets = [0, 16], sizes = [8, 8], strides = [1, 1]} : vector<8x24xf32> to vector<8x8xf32>
    %cst_6 = arith.constant dense<0.000000e+00> : vector<8x8xf32>
    %10 = tpu.matmul %7, %8, %cst_6 {dimension_numbers = #tpu.dot_dimension_numbers<[1], [1], [0], [0], [0, 0, 1, 0], [], []>} : vector<8x8xf32>, vector<8x8xf32>, vector<8x8xf32> -> vector<8x8xf32>
    %cst_7 = arith.constant 0.353553385 : f32
    %11 = vector.broadcast %cst_7 : f32 to vector<8x8xf32>
    %12 = arith.mulf %10, %11 : vector<8x8xf32>
    %cst_8 = arith.constant dense<0xFF800000> : vector<8xf32>
    %13 = vector.multi_reduction <maximumf>, %12, %cst_8 [1] : vector<8x8xf32> to vector<8xf32>
    %14 = vector.shape_cast %13 : vector<8xf32> to vector<8x1xf32>
    %15 = vector.broadcast %14 : vector<8x1xf32> to vector<8x8xf32>
    %16 = arith.subf %12, %15 : vector<8x8xf32>
    %17 = math.exp %16 : vector<8x8xf32>
    %cst_9 = arith.constant dense<0.000000e+00> : vector<8xf32>
    %18 = vector.multi_reduction <add>, %17, %cst_9 [1] : vector<8x8xf32> to vector<8xf32>
    %19 = vector.shape_cast %18 : vector<8xf32> to vector<8x1xf32>
    %20 = tpu.reciprocal %19 {approx = true} : vector<8x1xf32> -> vector<8x1xf32>
    %21 = vector.broadcast %20 : vector<8x1xf32> to vector<8x8xf32>
    %22 = arith.mulf %17, %21 : vector<8x8xf32>
    %cst_10 = arith.constant dense<0.000000e+00> : vector<8x8xf32>
    %23 = tpu.matmul %22, %9, %cst_10 {dimension_numbers = #tpu.dot_dimension_numbers<[1], [0], [0], [1], [0, 0, 1, 1], [], []>} : vector<8x8xf32>, vector<8x8xf32>, vector<8x8xf32> -> vector<8x8xf32>
    %c0_11 = arith.constant 0 : index
    %c0_12 = arith.constant 0 : index
    %c0_13 = arith.constant 0 : index
    %24 = vector.load %arg4[%c0_11, %c0_12, %c0_13] : memref<1x8x8xf32, #tpu.memory_space<vmem>>, vector<1x8x8xf32>
    %25 = vector.shape_cast %24 : vector<1x8x8xf32> to vector<8x8xf32>
    %26 = vector.shape_cast %23 : vector<8x8xf32> to vector<1x8x8xf32>
    tpu.vector_store %arg4[%c0_11, %c0_12, %c0_13], %26 {strides = array<i32>} : memref<1x8x8xf32, #tpu.memory_space<vmem>>, vector<1x8x8xf32>,
    return
  }
  func.func @transform_0(%arg0: i32) -> (i32, i32, i32) {
    %c0_i32 = arith.constant 0 : i32
    %c0_i32_0 = arith.constant 0 : i32
    %c0_i32_1 = arith.constant 0 : i32
    return %arg0, %c0_i32, %c0_i32_0 : i32, i32, i32
  }
  func.func @transform_1(%arg0: i32) -> (i32, i32) {
    %c0_i32 = arith.constant 0 : i32
    %c0_i32_0 = arith.constant 0 : i32
    %c0_i32_1 = arith.constant 0 : i32
    return %c0_i32, %c0_i32_0 : i32, i32
  }
  func.func @transform_2(%arg0: i32) -> (i32, i32) {
    %c0_i32 = arith.constant 0 : i32
    %c0_i32_0 = arith.constant 0 : i32
    %c0_i32_1 = arith.constant 0 : i32
    return %c0_i32, %c0_i32_0 : i32, i32
  }
  func.func @transform_3(%arg0: i32) -> (i32, i32, i32) {
    %c0_i32 = arith.constant 0 : i32
    %c0_i32_0 = arith.constant 0 : i32
    %c0_i32_1 = arith.constant 0 : i32
    return %arg0, %c0_i32, %c0_i32_0 : i32, i32, i32
  }
}

</mosaic_0001>

<bundles_post_ra>
// kernel: tpu_custom_call.1
= control target key start
LH: loop header
LB: loop body
LE: loop exit
PB: predicated region body
PF: predicated region fallthrough
CT: control target
= control target key end

     0   :  { %8 = vsyncpa [#allocation3], 0  ;;  %s805_s0 = inlined_call_operand.vmem [shape: f32[2,8,32], index: 0, kind: input, shape index: {}]   ;;  %s806_s1 = inlined_call_operand.vmem [shape: f32[32,24], index: 1, kind: input, shape index: {}]   ;;  %s807_s2 = inlined_call_operand.vmem [shape: f32[1,24], index: 2, kind: input, shape index: {}]   ;;  %s808_s3 = inlined_call_operand.hbm [shape: f32[2,8,8], index: 3, kind: output, shape index: {}]  }
   0x1   :  { %10 = vsyncpa [#allocation3 + $0x1], 0  ;;  %s681_s12 = smov 0   ;;  %s683_s13 = smov 0  }
   0x2   :  { %s685_s14 = smov 0   ;;  %s687_s15 = smov 0  }
   0x3 LB: > { %s702_s16 = sadd.s32 4294967295, %s653_s15   ;;  %s492_s17 = sadd.s32 4294967294, %s653_s15   ;;  %s653_s15 = sphi %s687_s15, %s814_s15   ;;  %s649_s14 = sphi %s685_s14, %s813_s14   ;;  %s645_s13 = sphi %s683_s13, %s812_s13   ;;  %s641_s12 = sphi %s681_s12, %s811_s12  }
   0x4   : > { %s706_s18 = sadd.s32 1, %s653_s15   ;;  %s91_s19 = sadd.s32 1, %s649_s14 }
   0x5   : > { %s88_s20 = ssub.s32 %s653_s15, %s706_s18  ;;  %p101_p0 = scmp.ne.s32.totalorder %s649_s14, %s645_s13 }
   0x6   : > { %p89_p1 = scmp.eq.s32.totalorder %s88_s20, 0  ;;  %p102_p2 = scmp.eq.s32.totalorder %s702_s16, 1 }
   0x7   : > { %p107_p3 = scmp.ne.s32.totalorder %s645_s13, %s641_s12  ;;  %p108_p4 = scmp.eq.s32.totalorder %s492_s17, 1 }
   0x8   : > { %s717_s21 = scalar_select %p89_p1, %s649_s14, %s91_s19  }
   0x9   : > { %p719_p5 = por %p102_p2, %p101_p0  ;;  %p723_p6 = por %p108_p4, %p107_p3 }
   0xa   : > { %p495_p7 = scmp.ge.s32.totalorder %s653_s15, 1  ;;  %p139_p8 = scmp.lt.s32.totalorder %s653_s15, 3 }
   0xc   : > { %p140_p9 = pnand %p495_p7, %p139_p8 }
   0xd   : > { %v167_v0 = vld [vmem:[%s806_s1] sm:$0xff] (!%p140_p9)  ;;  %v168_v1 = vld [vmem:[%s806_s1 + $0x8] sm:$0xff] (!%p140_p9)  ;;  %v169_v2 = vld [vmem:[%s806_s1 + $0x10] sm:$0xff] (!%p140_p9)  ;;  %v655_v3 = vmov (!%p140_p9), 0.0|0.0   ;;  %vm656_vm0 = vmmov (!%p140_p9), 0   ;;  %v657_v6 = vmov (!%p140_p9), 0.0  }
   0xe   : > { %143 = sbr.rel (%p140_p9) target bundleno = 1112 (0x458), region = 32  ;;  %537 = vmatprep.subr.bf16.mxu0 (!%p140_p9), %v655_v3  ;;  %v538_v4 = vpack.c.bf16 (!%p140_p9), %v168_v1, %v167_v0  ;;  %v170_v5 = vld [vmem:[%s806_s1 + $0x18] sm:$0xff] (!%p140_p9)  ;;  %524 = vmatprep.mubr.msk.f32.mxu0 (!%p140_p9), %vm656_vm0, %v657_v6  ;;  %p162_p10 = scmp.lt.s32.totalorder (!%p140_p9), %s702_s16, 1  ;;  %vm178_vm1 = vcmask (!%p140_p9), 261120   ;;  %v498_v9 = vld [vmem:[%s807_s2] ss:$0 sm:$0xff] (!%p140_p9) }
   0xf   : > { %527 = vmatprep.subr.mxu1 (!%p140_p9), %v657_v6  ;;  %529 = vmatprep.mubr.msk.f32.mxu1 (!%p140_p9), %vm656_vm0, %v657_v6  ;;  %v541_v7 = vpack.c.bf16 (!%p140_p9), %v170_v5, %v169_v2  ;;  %s658_s17 = smov (!%p140_p9), 120   ;;  %vm255_vm2 = vcmask (!%p140_p9), 64512   ;;  %s659_s19 = smov (!%p140_p9), 112  }
  0x10   : > { %539 = vmatpush3.bf16.msra.mxu0 (!%p140_p9), %v538_v4  ;;  %s159_s20 = sand.u32 (!%p140_p9), 1, %s645_s13   ;;  %s504_s25 = sshll.u32 (!%p140_p9), %s702_s16, 7 }
  0x11   : > { %540 = vmatprep.subr.bf16.mxu0 (!%p140_p9), %v655_v3  ;;  %s496_s24 = sshll.u32 (!%p140_p9), %s159_s20, 3  ;;  %s762_s30 = scalar_lea.hbm (!%p140_p9), %s808_s3, %s504_s25 }
  0x12   : > { %s161_s26 = scalar_lea.vmem (!%p140_p9), [#allocation2], %s496_s24  ;;  %s420_s4 = scalar_lea.sflag (!%p140_p9), [#allocation3], %s159_s20 }
  0x13   : > { %s433_s27 = sshll.u32 (!%p140_p9), %s161_s26, 4  ;;  %s764_s27 = int_to_ptr.vmem [resolvable:$true] %s433_s27 }
  0x14   : > { %542 = vmatpush3.bf16.msra.mxu0 (!%p140_p9), %v541_v7 }
  0x15   : > { %s163_s5 = scalar_select %p162_p10, %s702_s16, 1 }
  0x16   : > { %s660_s16 = smov [#allocation2]  }
  0x17   : > { %s497_s6 = sshll.u32 %s163_s5, 3  ;;  %s591_s5 = scalar_lea.vmem %s764_s27, 128 }
  0x18   : > { %s165_s9 = scalar_lea.vmem %s805_s0, %s497_s6  ;;  %p592_p11 = scmp.ne.s32.totalorder %s764_s27, %s591_s5 }
  0x19   : > { %v166_v8 = vld [vmem:[%s165_s9] sm:$0xff]  ;;  %s595_s6 = sshll.u32 %s660_s16, 4  ;;  %s596_s6 = int_to_ptr.vmem [resolvable:$false] %s595_s6 }
  0x1a   : > { %525 = vmatmul.mubr.msk.f32.vlgmr.msra.gmra.mrb[0].mxu0 %vm178_vm1, %v166_v8  ;;  %p593_p12 = pnand %p592_p11, %p719_p5  ;;  %s597_s7 = scalar_lea.vmem %s596_s6, 256 }
  0x1b   : > { %p598_p0 = scmp.lt.s32.totalorder %s764_s27, %s596_s6  ;;  %p599_p1 = scmp.lt.s32.totalorder %s597_s7, %s591_s5 }
  0x1c   : > { %p594_p13 = pneg %p593_p12 }
  0x1d   : > { %p600_p2 = por %p599_p1, %p598_p0 }
  0x1f   : > { %p601_p3 = pnand %p600_p2, %p594_p13 }
  0xed   : > { %v248_v10 = vpop.f32.mrb[0].mxu0 }
  0xee   : > { %v249_v11 = vadd.f32 %v498_v9, %v248_v10  ;;  %v526_v12 = vpop.f32.mrb[1].mxu0 }
  0xf0   : > { %253 = vrot.lane.b32.xlu0 %v249_v11, %s658_s17 }
 0x162   : > { %v254_v13 = vpop.permute.xlu0 %253 }
 0x163   : > { %528 = vmatpush3.xpose.msk.msra.mxu1 %vm255_vm2, %v254_v13 }
 0x164   : > { %532 = vmatprep.subr.mxu1 %v657_v6 }
 0x166   : > { %530 = vmatmul.mubr.msk.f32.vlgmr.msra.gmra.mrb[0].mxu1 %vm255_vm2, %v249_v11 }
 0x167   : > { %534 = vmatprep.mubr.msk.f32.mxu1 %vm656_vm0, %v657_v6 }
 0x239   : > { %v326_v14 = vpop.f32.mrb[0].mxu1 }
 0x23a   : > { %v330_v15 = vmul.f32 0.35355338, %v326_v14  ;;  %v531_v16 = vpop.f32.mrb[1].mxu1 }
 0x23c   : > { %v331_v17 = vsel %vm255_vm2, %v330_v15, -inf }
 0x23d   : > { %332 = vmax.xlane.f32.xlu0 %v331_v17 }
 0x2ca   : > { %v333_v18 = vpop.xlane.xlu0 %332 }
 0x2cb   : > { %v334_v19 = vsub.f32 %v330_v15, %v333_v18 }
 0x2cd   : > { %v335_v20 = vmul.f32 1.442695, %v334_v19 }
 0x2cf   : > { %587 = vpow2.f32 %v335_v20 }
 0x2d9   : > { %v588_v21 = vpop.eup %587 }
 0x2da   : > { %v337_v22 = vsel %vm255_vm2, %v588_v21, 0.0 }
 0x2db   : > { %338 = vadd.xlane.f32.xlu1 %v337_v22 }
 0x2ec   : > { %342 = vrot.lane.b32.xlu1 %v249_v11, %s659_s19 }
 0x368   : > { %v339_v23 = vpop.xlane.xlu1 %338 }
 0x369   : > { %589 = vrcp.f32 %v339_v23 }
 0x36c   : > { %v343_v24 = vpop.permute.xlu1 %342 }
 0x36d   : > { %533 = vmatpush3.msra.mxu1 %v343_v24 }
 0x373   : > { %v590_v25 = vpop.eup %589 }
 0x374   : > { %v341_v26 = vmul.f32 %v590_v25, %v588_v21 }
 0x376   : > { %535 = vmatmul.mubr.msk.f32.vlgmr.msra.gmra.mrb[2].mxu1 %vm255_vm2, %v341_v26 }
 0x449   : > { %v414_v27 = vpop.f32.mrb[2].mxu1 }
 0x44a   : > { %418 = vst.msk [vmem:[%s161_s26] sm:$0xff] %vm255_vm2, %v414_v27  ;;  %v536_v28 = vpop.f32.mrb[3].mxu1 }
 0x44b   : > { %604 = shalt.err (!%p601_p3)
}
 0x44c   : > { %s605_s8 = scalar_lea.hbm %s762_s30, 128  ;;  %s609_s11 = scalar_lea.hbm %s808_s3, 256 }
 0x44d   : > { %p606_p4 = scmp.ne.s32.totalorder %s762_s30, %s605_s8  ;;  %p610_p9 = scmp.lt.u32.totalorder %s762_s30, %s808_s3 }
 0x44e   : > { %p611_p10 = scmp.lt.u32.totalorder %s609_s11, %s605_s8  ;;  %p613_p12 = scmp.lt.u32.totalorder %s605_s8, %s762_s30 }
 0x44f   : > { %p607_p7 = pnand %p606_p4, %p719_p5 }
 0x450   : > { %p612_p11 = por %p611_p10, %p610_p9 }
 0x451   : > { %p608_p8 = pneg %p607_p7 }
 0x452   : > { %p614_p13 = por %p613_p12, %p612_p11 }
 0x454   : > { %p615_p0 = pnand %p614_p13, %p608_p8 }
 0x456   : > { %618 = shalt.err (!%p615_p0)
}
 0x457   : > { %543 = dma.vmem_to_hbm [thread:$0]  (%p719_p5), %s764_s27, 128, %s762_s30, %s420_s4  }
 0x458 PF: > { %p549_p1 = scmp.ge.s32.totalorder %s653_s15, 2  ;;  %s445_s20 = sand.u32 1, %s641_s12  }
 0x459   : > { %s446_s24 = scalar_lea.sflag [#allocation3], %s445_s20 }
 0x45a   : > { %p546_p2 = pnand %p549_p1, %p723_p6 }
 0x45c   : > { %636 = dma.done.wait (!%p546_p2), %s446_s24, 128  }
 0x45d   : > { %638 = vsyncadd (!%p546_p2), %s446_s24, 4294967168  ;;  %p13_p3 = scmp.ge.s32.totalorder %s706_s18, 4   ;;  %s811_s12 = smov %s645_s13 }
 0x45e   : > { %s812_s13 = smov %s649_s14  ;;  %s813_s14 = smov %s717_s21 }
 0x45f   : > { %s814_s15 = smov %s706_s18  ;;  %15 = sbr.rel (!%p13_p3) target bundleno = 3 (0x3), region = 67 }
 0x466   :  { %451 = vsyncpa [#allocation3], 1 }
 0x467   :  { %453 = vsyncpa [#allocation3 + $0x1], 1 }

</bundles_post_ra>
